<compile_context>
chip_gen: v5e
topology: v5e:2x2
jax: 0.10.0
libtpu: 0.0.40
codegen_flags: <defaults>
</compile_context>

<pallas_src>
import functools
import math

import jax
import jax.numpy as jnp
from jax.experimental import pallas as pl
from jax.experimental.pallas import tpu as pltpu

_LANE = 128
_TARGET_BLOCK_BYTES = 4 * 1024 * 1024   # ~4 MiB blocks: >=85% of HBM roofline
_VMEM_LIMIT_BYTES = 32 * 1024 * 1024    # safe scoped-VMEM cap on v5e/v6e/v7x


# ----------------------------------------------------------------------------
# Pallas kernel: per-sample scale of a (tb, tm) tile.
# ----------------------------------------------------------------------------
def _drop_path_kernel(x_ref, s_ref, o_ref):
    # Per-sample scale broadcast across lanes; compute in the I/O dtype so the
    # bf16 path never round-trips through f32 (free on v6e/v7x bf16 VPUs).
    s = s_ref[...].astype(o_ref.dtype)          # (tb, 1)
    o_ref[...] = x_ref[...] * s


# ----------------------------------------------------------------------------
# Tiling heuristics.
# ----------------------------------------------------------------------------
def _even_tile(dim, want, align):
    """Balanced, `align`-aligned tiling of `dim` with tiles of roughly <= `want`.

    Returns either the full `dim` (single block -- always a legal block shape)
    or a multiple of `align`; any ragged tail is handled by the pl.cdiv grid
    (Pallas masks the out-of-bounds part of the last block).
    """
    if dim <= want or dim <= align:
        return dim
    units = pl.cdiv(dim, align)
    want_units = max(1, want // align)
    n_blocks = pl.cdiv(units, want_units)
    tile = align * pl.cdiv(units, n_blocks)
    return dim if tile >= dim else tile


def _choose_tiles(B, M, itemsize):
    """Pick a lane-dense, packing-aligned, ~4 MiB (tb, tm) block."""
    pack = max(8, 32 // max(1, itemsize))   # sublanes: f32 -> 8, bf16 -> 16, i8 -> 32

    # Rows first: keep the whole (usually small) batch per block, otherwise an
    # even pack-aligned split; then widen the columns to hit the byte target.
    rows_wanted = max(1, _TARGET_BLOCK_BYTES // max(1, M * itemsize))
    tb = _even_tile(B, rows_wanted, pack)
    cols_wanted = max(_LANE, _TARGET_BLOCK_BYTES // max(1, tb * itemsize))
    tm = _even_tile(M, cols_wanted, _LANE)

    # v7x megacore: guarantee >= 2 steps on a "parallel" axis when the whole
    # array would otherwise fit in a single block (costs nothing when
    # memory-bound; one TensorCore would sit idle otherwise).
    if tb >= B and tm >= M:
        if M >= 2 * _LANE:
            tm = _even_tile(M, _LANE * pl.cdiv(pl.cdiv(M, _LANE), 2), _LANE)
        elif B >= 2 * pack:
            tb = _even_tile(B, pack * pl.cdiv(pl.cdiv(B, pack), 2), pack)
    return tb, tm


# ----------------------------------------------------------------------------
# Tiled pallas_call: y[b, m] = x[b, m] * scale[b, 0]   (in place).
# ----------------------------------------------------------------------------
@functools.partial(jax.jit, donate_argnums=(0,))
def _drop_path_scale(x2d, scale2d):
    B, M = x2d.shape
    tb, tm = _choose_tiles(B, M, jnp.dtype(x2d.dtype).itemsize)
    grid = (pl.cdiv(B, tb), pl.cdiv(M, tm))
    return pl.pallas_call(
        _drop_path_kernel,
        out_shape=jax.ShapeDtypeStruct((B, M), x2d.dtype),
        grid=grid,
        in_specs=[
            pl.BlockSpec((tb, tm), lambda i, j: (i, j)),
            # Scale block index is constant over the inner j loop, so it stays
            # resident and is only re-fetched when i changes.
            pl.BlockSpec((tb, 1), lambda i, j: (i, 0)),
        ],
        out_specs=pl.BlockSpec((tb, tm), lambda i, j: (i, j)),
        input_output_aliases={0: 0},        # write back in place (x2d donated)
        compiler_params=pltpu.CompilerParams(
            dimension_semantics=("parallel", "parallel"),
            vmem_limit_bytes=_VMEM_LIMIT_BYTES),
    )(x2d, scale2d)


# ----------------------------------------------------------------------------
# Functional + module-equivalent wrappers.
# ----------------------------------------------------------------------------
def drop_path_pallas(x, key, drop_prob=0.0, training=False, scale_by_keep=True):
    """Mirrors drop_path() from the PyTorch spec."""
    drop_prob = float(drop_prob or 0.0)
    if drop_prob == 0.0 or not training:
        return x
    keep_prob = 1.0 - drop_prob
    B = x.shape[0]
    M = int(math.prod(x.shape[1:])) if x.ndim > 1 else 1
    # Per-sample Bernoulli(keep_prob) mask (torch: x.new_empty(...).bernoulli_).
    mask = jax.random.bernoulli(key, p=keep_prob, shape=(B,)).astype(jnp.float32)
    if keep_prob > 0.0 and scale_by_keep:
        scale = mask / keep_prob
    else:
        scale = mask
    y2d = _drop_path_scale(x.reshape(B, M), scale.reshape(B, 1))
    return y2d.reshape(x.shape)


class DropPathPallas:
    """Module-equivalent of the PyTorch DropPath (stochastic depth)."""

    def __init__(self, drop_prob=None, scale_by_keep=True):
        self.drop_prob = drop_prob
        self.scale_by_keep = scale_by_keep
        self.training = True   # nn.Module default mode

    def __call__(self, x, key):
        return drop_path_pallas(x, key, self.drop_prob or 0.0,
                                self.training, self.scale_by_keep)


# ----------------------------------------------------------------------------
# Deterministic self-test.
# ----------------------------------------------------------------------------
if __name__ == "__main__":
    key = jax.random.PRNGKey(0)
    kx, kx2, kd = jax.random.split(key, 3)

    # --- case 1: ConvNext-style residual branch, f32 NCHW --------------------
    x = jax.random.normal(kx, (2, 4, 16, 16), jnp.float32)
    drop_prob = 0.25
    keep_prob = 1.0 - drop_prob

    dp = DropPathPallas(drop_prob=drop_prob, scale_by_keep=True)
    dp.training = True
    y = jax.block_until_ready(dp(x, kd))

    mask = jax.random.bernoulli(kd, keep_prob, (x.shape[0],)).astype(jnp.float32)
    ref = x * (mask / keep_prob)[:, None, None, None]
    assert y.shape == x.shape and y.dtype == x.dtype
    assert float(jnp.max(jnp.abs(y - ref))) < 1e-6

    # --- case 2: eval mode is an exact identity -------------------------------
    dp.training = False
    y_eval = jax.block_until_ready(dp(x, kd))
    assert bool(jnp.array_equal(y_eval, x))

    # --- case 3: ragged inner dim (M=300), bf16, 2-step lane grid -------------
    x2 = jax.random.normal(kx2, (10, 3, 10, 10), jnp.float32).astype(jnp.bfloat16)
    dp2 = DropPathPallas(drop_prob=0.5, scale_by_keep=True)
    dp2.training = True
    y2 = jax.block_until_ready(dp2(x2, kd))
    mask2 = jax.random.bernoulli(kd, 0.5, (x2.shape[0],)).astype(jnp.float32)
    ref2 = (x2.astype(jnp.float32)
            * (mask2 / 0.5)[:, None, None, None]).astype(jnp.bfloat16)
    assert y2.shape == x2.shape and y2.dtype == x2.dtype
    assert float(jnp.max(jnp.abs(y2.astype(jnp.float32)
                                 - ref2.astype(jnp.float32)))) < 1e-2

    print("KERNEL_OK")
</pallas_src>

<mosaic_0001>
module attributes {stable_mosaic.version = 11 : i64} {
  func.func @_drop_path_kernel(%arg0: i32, %arg1: i32, %arg2: memref<2x512xf32, #tpu.memory_space<vmem>>, %arg3: memref<2x1xf32, #tpu.memory_space<vmem>>, %arg4: memref<2x512xf32, #tpu.memory_space<vmem>>) attributes {dimension_semantics = [#tpu.dimension_semantics<parallel>, #tpu.dimension_semantics<parallel>], iteration_bounds = array<i64: 1, 2>, scalar_prefetch = 0 : i64, scratch_operands = 0 : i64, tpu.core_type = #tpu.core_type<tc>, window_params = [{transform_indices = @transform_0, window_bounds = array<i64: 2, 512>}, {transform_indices = @transform_1, window_bounds = array<i64: 2, 1>}, {transform_indices = @transform_2, window_bounds = array<i64: 2, 512>}]} {
    %c0 = arith.constant 0 : index
    %c0_0 = arith.constant 0 : index
    %0 = vector.load %arg3[%c0, %c0_0] : memref<2x1xf32, #tpu.memory_space<vmem>>, vector<2x1xf32>
    %c0_1 = arith.constant 0 : index
    %c0_2 = arith.constant 0 : index
    %1 = vector.load %arg2[%c0_1, %c0_2] : memref<2x512xf32, #tpu.memory_space<vmem>>, vector<2x512xf32>
    %2 = vector.broadcast %0 : vector<2x1xf32> to vector<2x512xf32>
    %3 = arith.mulf %1, %2 : vector<2x512xf32>
    %c0_3 = arith.constant 0 : index
    %c0_4 = arith.constant 0 : index
    %4 = vector.load %arg4[%c0_3, %c0_4] : memref<2x512xf32, #tpu.memory_space<vmem>>, vector<2x512xf32>
    tpu.vector_store %arg4[%c0_3, %c0_4], %3 {strides = array<i32>} : memref<2x512xf32, #tpu.memory_space<vmem>>, vector<2x512xf32>,
    return
  }
  func.func @transform_0(%arg0: i32, %arg1: i32) -> (i32, i32) {
    %c0_i32 = arith.constant 0 : i32
    return %arg0, %arg1 : i32, i32
  }
  func.func @transform_1(%arg0: i32, %arg1: i32) -> (i32, i32) {
    %c0_i32 = arith.constant 0 : i32
    %c0_i32_0 = arith.constant 0 : i32
    return %arg0, %c0_i32 : i32, i32
  }
  func.func @transform_2(%arg0: i32, %arg1: i32) -> (i32, i32) {
    %c0_i32 = arith.constant 0 : i32
    return %arg0, %arg1 : i32, i32
  }
}

</mosaic_0001>

<bundles_post_ra>
// kernel: _drop_path_scale.1
= control target key start
LH: loop header
LB: loop body
LE: loop exit
PB: predicated region body
PF: predicated region fallthrough
CT: control target
= control target key end

     0   :  { %7 = vsyncpa [#allocation3], 0  ;;  %s667_s0 = inlined_call_operand.hbm [shape: f32[2,1024], index: 0, kind: input, shape index: {}, may-alias: {0,2}]   ;;  %s668_s1 = inlined_call_operand.vmem [shape: f32[2,1], index: 1, kind: input, shape index: {}]   ;;  %s669_s2 = inlined_call_operand.hbm [shape: f32[2,1024], index: 2, kind: output, shape index: {}, may-alias: {0,2}]  }
   0x1   :  { %9 = vsyncpa [#allocation3 + $0x1], 0 }
   0x2   :  { %10 = vsyncpa [#allocation4], 0 }
   0x3   :  { %12 = vsyncpa [#allocation4 + $0x1], 0  ;;  %s544_s9 = smov 0   ;;  %s546_s10 = smov 0  }
   0x4   :  { %s548_s11 = smov 0   ;;  %s550_s12 = smov 0  }
   0x5   :  { %s552_s13 = smov 0   ;;  %s554_s14 = smov 0  }
   0x6 LB: > { %s330_s15 = sadd.s32 4294967295, %s525_s14   ;;  %s331_s16 = sadd.s32 4294967294, %s525_s14   ;;  %s525_s14 = sphi %s554_s14, %s18_s14   ;;  %s521_s13 = sphi %s552_s13, %s678_s13   ;;  %s517_s12 = sphi %s550_s12, %s677_s12   ;;  %s513_s11 = sphi %s548_s11, %s676_s11   ;;  %s509_s10 = sphi %s546_s10, %s675_s10   ;;  %s505_s9 = sphi %s544_s9, %s674_s9  }
   0x7   : > { %s27_s17 = sadd.s32 1, %s521_s13  ;;  %s39_s18 = sadd.s32 1, %s513_s11 }
   0x8   : > { %p28_p0 = scmp.ge.s32.totalorder %s27_s17, 2  ;;  %p46_p1 = scmp.ne.s32.totalorder %s513_s11, %s509_s10 }
   0x9   : > { %p47_p2 = scmp.eq.s32.totalorder %s525_s14, 0  ;;  %p52_p3 = scmp.ne.s32.totalorder %s509_s10, %s505_s9 }
   0xa   : > { %s680_s17 = smov (%p28_p0, %s27_s17), 0  ;;  %p53_p5 = scmp.eq.s32.totalorder %s330_s15, 0 }
   0xb   : > { %p585_p4 = por %p47_p2, %p46_p1  ;;  %s35_s20 = ssub.s32 %s521_s13, %s680_s17 }
   0xc   : > { %p104_p6 = scmp.eq.s32.totalorder %s330_s15, 1  ;;  %p37_p7 = scmp.eq.s32.totalorder %s35_s20, 0 }
   0xd   : > { %p591_p8 = por %p53_p5, %p52_p3  ;;  %p110_p10 = scmp.eq.s32.totalorder %s331_s16, 1 }
   0xe   : > { %p595_p9 = por %p104_p6, %p46_p1  ;;  %p334_p12 = scmp.ge.s32.totalorder %s525_s14, 2 }
   0xf   : > { %s600_s23 = scalar_select %p37_p7, %s513_s11, %s39_s18  }
  0x10   : > { %p602_p11 = por %p110_p10, %p52_p3  ;;  %p360_p13 = scmp.lt.s32.totalorder %s525_s14, 2 }
  0x11   : > { %s137_s25 = sand.u32 1, %s513_s11   ;;  %s346_s27 = sshll.u32 %s521_s13, 3 }
  0x12   : > { %s335_s26 = sshll.u32 %s137_s25, 3  ;;  %s148_s30 = scalar_lea.hbm %s667_s0, %s346_s27 }
  0x13   : > { %s141_s3 = scalar_lea.vmem [#allocation2], %s335_s26  ;;  %s150_s5 = sshll.u32 %s148_s30, 4  ;;  %s151_s5 = int_to_ptr.hbm [resolvable:$true] %s150_s5 }
  0x14   : > { %s152_s4 = sshll.u32 %s141_s3, 4  ;;  %p353_p0 = pnand %p360_p13, %p585_p4  ;;  %s153_s4 = int_to_ptr.vmem [resolvable:$true] %s152_s4 }
  0x15   : > { %p338_p1 = scmp.ge.s32.totalorder %s525_s14, 1  ;;  %p157_p2 = scmp.lt.s32.totalorder %s525_s14, 3 }
  0x16   : > { %s138_s6 = scalar_lea.sflag [#allocation3], %s137_s25 }
  0x17   : > { %355 = dma.hbm_to_vmem [thread:$0]  (!%p353_p0), %s151_s5, 128, %s153_s4, %s138_s6  }
  0x18   : > { %p158_p3 = pnand %p338_p1, %p157_p2 }
  0x19   : > { %s618_s7 = sand.u32 (!%p158_p3), 1, %s509_s10  }
  0x1a   : > { %161 = sbr.rel (%p158_p3) target bundleno = 156 (0x9c), region = 28  ;;  %s339_s8 = sshll.u32 (!%p158_p3), %s618_s7, 3 }
  0x1b   : > { %s164_s15 = scalar_lea.sflag (!%p158_p3), [#allocation3], %s618_s7  ;;  %s167_s16 = scalar_lea.vmem (!%p158_p3), [#allocation2], %s339_s8 }
  0x1f   : > { %496 = dma.done.wait (%p591_p8), %s164_s15, 128  }
  0x20   : > { %498 = vsyncadd (%p591_p8), %s164_s15, 4294967168  ;;  %v527_v0 = vmov 0   ;;  %v199_v1 = vld [vmem:[%s668_s1] sm:$0x3]  ;;  %v528_v2 = vmov 269488144  }
  0x21   : > { %412 = vset.pattern.permute.xlu0 %v527_v0  ;;  %v206_v3 = vunpack.c.l.s4 %v528_v2  ;;  %s347_s20 = sshll.u32 %s517_s12, 3  ;;  %v200_v5 = vld [vmem:[%s167_s16] sm:$0xff]  ;;  %s192_s21 = scalar_lea.vmem [#allocation5], %s339_s8 }
  0x22   : > { %203 = vperm.xlu0 %412, %v199_v1   ;;  %s226_s27 = scalar_lea.hbm %s669_s2, %s347_s20  ;;  %s228_s28 = sshll.u32 %s192_s21, 4  ;;  %s229_s28 = int_to_ptr.vmem [resolvable:$true] %s228_s28 }
  0x23   : > { %v207_v4 = vunpack.c.0.s8 %v206_v3  ;;  %s230_s29 = sshll.u32 %s226_s27, 4  ;;  %s213_s30 = scalar_lea.sflag [#allocation4], %s618_s7  ;;  %s231_s29 = int_to_ptr.hbm [resolvable:$true] %s230_s29 }
  0x24   : > { %s457_s3 = sshra.s32 %s231_s29, 4  ;;  %s463_s6 = scalar_lea.hbm %s669_s2, 16  ;;  %s458_s3 = int_to_ptr.hbm [resolvable:$true] %s457_s3 }
  0x25   : > { %s459_s12 = scalar_lea.hbm %s458_s3, 8  ;;  %p464_p7 = scmp.lt.s32.totalorder %s458_s3, %s669_s2 }
  0x26   : > { %p460_p4 = scmp.ne.s32.totalorder %s458_s3, %s459_s12  ;;  %p465_p8 = scmp.lt.s32.totalorder %s463_s6, %s459_s12 }
  0x28   : > { %p461_p5 = pnand %p460_p4, %p595_p9  ;;  %p466_p10 = por %p465_p8, %p464_p7 }
  0x2a   : > { %p462_p6 = pneg %p461_p5 }
  0x2c   : > { %p467_p13 = pnand %p466_p10, %p462_p6 }
  0x94   : > { %v204_v6 = vpop.permute.xlu0 %203 }
  0x95   : > { %v208_v7 = vperm.slane %v204_v6, %v207_v4 }
  0x97   : > { %v210_v8 = vmul.f32 %v208_v7, %v200_v5 }
  0x99   : > { %211 = vst [vmem:[%s192_s21] sm:$0xff] %v210_v8 }
  0x9a   : > { %470 = shalt.err (!%p467_p13)
}
  0x9b   : > { %350 = dma.vmem_to_hbm [thread:$0]  (%p595_p9), %s229_s28, 128, %s231_s29, %s213_s30  }
  0x9c PF: > { %s242_s7 = sand.u32 1, %s505_s9   ;;  %p357_p0 = pnand %p334_p12, %p602_p11 }
  0x9d   : > { %s243_s16 = scalar_lea.sflag [#allocation4], %s242_s7 }
  0x9e   : > { %p358_p1 = pneg %p357_p0 }
  0xa0   : > { %500 = dma.done.wait (%p358_p1), %s243_s16, 128  }
  0xa1   : > { %502 = vsyncadd (%p358_p1), %s243_s16, 4294967168  ;;  %s18_s14 = sadd.s32 1, %s525_s14   ;;  %s674_s9 = smov %s509_s10 }
  0xa2   : > { %p15_p2 = scmp.ge.s32.totalorder %s18_s14, 4   ;;  %s675_s10 = smov %s513_s11 }
  0xa3   : > { %s676_s11 = smov %s600_s23  ;;  %s677_s12 = smov %s521_s13 }
  0xa4   : > { %s678_s13 = smov %s680_s17  ;;  %17 = sbr.rel (!%p15_p2) target bundleno = 6 (0x6), region = 76 }
  0xa9   :  { %249 = vsyncpa [#allocation3], 1 }
  0xaa   :  { %251 = vsyncpa [#allocation3 + $0x1], 1 }
  0xab   :  { %252 = vsyncpa [#allocation4], 1 }
  0xac   :  { %254 = vsyncpa [#allocation4 + $0x1], 1 }

</bundles_post_ra>
